<compile_context>
chip_gen: v7x
topology: tpu7x:2x2x1
jax: 0.10.0
libtpu: 0.0.40
codegen_flags: <defaults>
</compile_context>

<pallas_src>
import jax
import jax.numpy as jnp
from jax.experimental import pallas as pl
from jax.experimental.pallas import tpu as pltpu

ALPHA = 0.8
GAMMA = 2.0

LANES = 128
SUBLANES = 8
MAX_TILE_ROWS = 4096           # (4096,128) f32 tile = 2 MiB; x2 inputs x2 buffers = 8 MiB
PAD_LOGIT = -1e4               # exp(-|PAD_LOGIT|) == 0 in f32 -> bce == 0 -> focal == 0
VMEM_LIMIT_BYTES = 32 * 1024 * 1024


def _cdiv(a, b):
    return -(-a // b)


def _round_up(x, m):
    return _cdiv(x, m) * m


def _sublane_align(itemsize):
    # Sub-32-bit dtypes pack rows along sublanes; keep tiles packing-friendly.
    return {4: 8, 2: 16, 1: 32}.get(itemsize, SUBLANES)


def _choose_tiling(rows, itemsize):
    """Pick (n_chunks, tiles_per_chunk, tile_rows) minimizing padding.

    Both chunks get identical tile counts/sizes (balanced across v7x's two
    TensorCores); total kernel-side row padding stays a small fraction of one
    tile instead of up to ~2x the input.
    """
    align = _sublane_align(itemsize)
    n_chunks = 2 if rows >= 2 * align else 1
    tiles_per_chunk = _cdiv(rows, n_chunks * MAX_TILE_ROWS)
    tile_rows = _round_up(_cdiv(rows, n_chunks * tiles_per_chunk), align)
    assert tile_rows <= MAX_TILE_ROWS
    return n_chunks, tiles_per_chunk, tile_rows


def _make_kernel(gamma):
    """Build the kernel, closing over static (Python) parameters."""
    g = float(gamma)
    g_int = int(g) if g.is_integer() and 0 <= g <= 8 else None

    def kernel(p_ref, t_ref, out_ref):
        i = pl.program_id(1)  # reduction axis within this chunk

        # out_ref is this chunk's (8,128) partial-sum block; same block index
        # for every i, so it stays resident in VMEM as the accumulator.
        @pl.when(i == 0)
        def _init():
            out_ref[...] = jnp.zeros_like(out_ref)

        p = p_ref[...].astype(jnp.float32)
        t = t_ref[...].astype(jnp.float32)

        # Numerically stable BCE-with-logits (matches torch.nn.BCEWithLogitsLoss).
        bce = jnp.maximum(p, 0.0) - p * t + jnp.log1p(jnp.exp(-jnp.abs(p)))

        if g_int == 0:
            focal = bce
        elif g_int is not None:
            # Integer gamma: repeated multiply on the VPU (keeps the single EUP
            # slot at 3 transcendentals/element instead of 5 for generic pow).
            pt = jnp.exp(-bce)                 # exact for soft targets too
            one_minus_pt = 1.0 - pt
            modulator = one_minus_pt
            for _ in range(g_int - 1):
                modulator = modulator * one_minus_pt
            focal = modulator * bce
        else:
            pt = jnp.exp(-bce)
            focal = ((1.0 - pt) ** g) * bce
        # alpha and the mean's 1/N are hoisted to the wrapper (linear in sum).

        # Fold the (tile_rows,128) tile down to one (8,128) slab with pure VPU
        # adds (no per-step cross-lane XLU reduce, no scalar SMEM RMW).
        tile_rows = focal.shape[0]
        partial = jnp.sum(
            focal.reshape(tile_rows // SUBLANES, SUBLANES, LANES), axis=0
        )
        out_ref[...] += partial

    return kernel


def focal_loss(p, t, alpha=ALPHA, gamma=GAMMA):
    """Focal loss over same-shaped logits/targets of any shape/float dtype."""
    assert p.shape == t.shape, "logits and targets must have the same shape"
    n = p.size
    assert n > 0

    itemsize = jnp.dtype(p.dtype).itemsize
    rows = _cdiv(n, LANES)
    n_chunks, tiles_per_chunk, tile_rows = _choose_tiling(rows, itemsize)
    rows_padded = n_chunks * tiles_per_chunk * tile_rows
    total_padded = rows_padded * LANES

    p_flat = p.reshape(-1)
    t_flat = t.reshape(-1)
    pad = total_padded - n
    if pad:
        # Zero-contribution padding: bce(PAD_LOGIT, 0) == 0 exactly in f32, so
        # padded slots add nothing -- no in-kernel mask needed.
        p_flat = jnp.pad(p_flat, (0, pad), constant_values=PAD_LOGIT)
        t_flat = jnp.pad(t_flat, (0, pad), constant_values=0)
    # Keep the original dtype in HBM (bf16 inputs stay bf16: half the DMA bytes).
    p2 = p_flat.reshape(rows_padded, LANES)
    t2 = t_flat.reshape(rows_padded, LANES)

    kernel = _make_kernel(float(gamma))

    in_block = pl.BlockSpec(
        (tile_rows, LANES), lambda c, i: (c * tiles_per_chunk + i, 0)
    )

    bytes_accessed = (
        p2.size * p2.dtype.itemsize
        + t2.size * t2.dtype.itemsize
        + n_chunks * SUBLANES * LANES * 4
    )
    cost = pl.CostEstimate(
        flops=10 * total_padded,
        transcendentals=3 * total_padded,
        bytes_accessed=bytes_accessed,
    )

    partials = pl.pallas_call(
        kernel,
        out_shape=jax.ShapeDtypeStruct((n_chunks * SUBLANES, LANES), jnp.float32),
        grid_spec=pltpu.PrefetchScalarGridSpec(
            num_scalar_prefetch=0,
            grid=(n_chunks, tiles_per_chunk),
            in_specs=[in_block, in_block],
            out_specs=pl.BlockSpec((SUBLANES, LANES), lambda c, i: (c, 0)),
        ),
        compiler_params=pltpu.CompilerParams(
            dimension_semantics=("parallel", "arbitrary"),
            vmem_limit_bytes=VMEM_LIMIT_BYTES,
        ),
        cost_estimate=cost,
    )(p2, t2)

    # alpha and the mean's 1/N applied once here (hoisted out of the hot loop).
    return jnp.sum(partials) * (jnp.float32(alpha) / jnp.float32(n))


def _focal_loss_ref(p, t, alpha=ALPHA, gamma=GAMMA):
    p = p.astype(jnp.float32)
    t = t.astype(jnp.float32)
    bce = jnp.maximum(p, 0.0) - p * t + jnp.log1p(jnp.exp(-jnp.abs(p)))
    pt = jnp.exp(-bce)
    return jnp.mean(alpha * (1.0 - pt) ** gamma * bce)


if __name__ == "__main__":
    key = jax.random.PRNGKey(0)

    test_cases = [
        # (shape, dtype) -- NCHW logits like the PyTorch module.
        ((2, 4, 16, 16), jnp.float32),     # small module-consistent shape, no pad
        ((3, 5, 37, 29), jnp.float32),     # ragged: element-level zero-contribution pad
        ((1, 1, 9, 128), jnp.float32),     # lane-aligned but sublane-ragged rows
        ((4, 8, 128, 128), jnp.float32),   # big: 2 balanced chunks, inner accumulation
        ((2, 4, 16, 16), jnp.bfloat16),    # bf16 HBM pass-through path
    ]

    for idx, (shape, dtype) in enumerate(test_cases):
        key, kp, kt = jax.random.split(key, 3)
        p = (jax.random.normal(kp, shape, dtype=jnp.float32) * 2.0).astype(dtype)
        t = (jax.random.uniform(kt, shape) > 0.5).astype(dtype)

        loss = jax.block_until_ready(focal_loss(p, t))
        ref = jax.block_until_ready(_focal_loss_ref(p, t))
        assert jnp.allclose(loss, ref, rtol=5e-5, atol=1e-6), (idx, float(loss), float(ref))

    print("KERNEL_OK")
</pallas_src>

<mosaic_0001>
module attributes {stable_mosaic.version = 11 : i64} {
  func.func @kernel(%arg0: i32, %arg1: i32, %arg2: memref<8x128xf32, #tpu.memory_space<vmem>>, %arg3: memref<8x128xf32, #tpu.memory_space<vmem>>, %arg4: memref<8x128xf32, #tpu.memory_space<vmem>>) attributes {dimension_semantics = [#tpu.dimension_semantics<parallel>, #tpu.dimension_semantics<arbitrary>], iteration_bounds = array<i64: 2, 1>, scalar_prefetch = 0 : i64, scratch_operands = 0 : i64, tpu.core_type = #tpu.core_type<tc>, window_params = [{transform_indices = @transform_0, window_bounds = array<i64: 8, 128>}, {transform_indices = @transform_1, window_bounds = array<i64: 8, 128>}, {transform_indices = @transform_2, window_bounds = array<i64: 8, 128>}]} {
    %c0_i32 = arith.constant 0 : i32
    %0 = arith.cmpi eq, %arg1, %c0_i32 : i32
    %1 = arith.extui %0 : i1 to i32
    %c0_i32_0 = arith.constant 0 : i32
    %2 = arith.cmpi ne, %1, %c0_i32_0 : i32
    scf.if %2 {
      %cst_12 = arith.constant 0.000000e+00 : f32
      %27 = vector.broadcast %cst_12 : f32 to vector<8x128xf32>
      %c0_13 = arith.constant 0 : index
      %c0_14 = arith.constant 0 : index
      %28 = vector.load %arg4[%c0_13, %c0_14] : memref<8x128xf32, #tpu.memory_space<vmem>>, vector<8x128xf32>
      tpu.vector_store %arg4[%c0_13, %c0_14], %27 {strides = array<i32>} : memref<8x128xf32, #tpu.memory_space<vmem>>, vector<8x128xf32>,
    } else {
    }
    %c0 = arith.constant 0 : index
    %c0_1 = arith.constant 0 : index
    %3 = vector.load %arg2[%c0, %c0_1] : memref<8x128xf32, #tpu.memory_space<vmem>>, vector<8x128xf32>
    %c0_2 = arith.constant 0 : index
    %c0_3 = arith.constant 0 : index
    %4 = vector.load %arg3[%c0_2, %c0_3] : memref<8x128xf32, #tpu.memory_space<vmem>>, vector<8x128xf32>
    %cst = arith.constant 0.000000e+00 : f32
    %5 = vector.broadcast %cst : f32 to vector<8x128xf32>
    %6 = arith.maximumf %3, %5 : vector<8x128xf32>
    %7 = arith.mulf %3, %4 : vector<8x128xf32>
    %8 = arith.subf %6, %7 : vector<8x128xf32>
    %9 = math.absf %3 : vector<8x128xf32>
    %cst_4 = arith.constant 0.000000e+00 : f32
    %10 = vector.broadcast %cst_4 : f32 to vector<8x128xf32>
    %11 = arith.subf %10, %9 : vector<8x128xf32>
    %12 = math.exp %11 : vector<8x128xf32>
    %13 = math.log1p %12 : vector<8x128xf32>
    %14 = arith.addf %8, %13 : vector<8x128xf32>
    %cst_5 = arith.constant 0.000000e+00 : f32
    %15 = vector.broadcast %cst_5 : f32 to vector<8x128xf32>
    %16 = arith.subf %15, %14 : vector<8x128xf32>
    %17 = math.exp %16 : vector<8x128xf32>
    %cst_6 = arith.constant 1.000000e+00 : f32
    %18 = vector.broadcast %cst_6 : f32 to vector<8x128xf32>
    %19 = arith.subf %18, %17 : vector<8x128xf32>
    %20 = arith.mulf %19, %19 : vector<8x128xf32>
    %21 = arith.mulf %20, %14 : vector<8x128xf32>
    %22 = vector.shape_cast %21 : vector<8x128xf32> to vector<1x8x128xf32>
    %cst_7 = arith.constant dense<0.000000e+00> : vector<8x128xf32>
    %23 = vector.multi_reduction <add>, %22, %cst_7 [0] : vector<1x8x128xf32> to vector<8x128xf32>
    %c0_8 = arith.constant 0 : index
    %c0_9 = arith.constant 0 : index
    %24 = vector.load %arg4[%c0_8, %c0_9] : memref<8x128xf32, #tpu.memory_space<vmem>>, vector<8x128xf32>
    %25 = arith.addf %24, %23 : vector<8x128xf32>
    %c0_10 = arith.constant 0 : index
    %c0_11 = arith.constant 0 : index
    %26 = vector.load %arg4[%c0_10, %c0_11] : memref<8x128xf32, #tpu.memory_space<vmem>>, vector<8x128xf32>
    tpu.vector_store %arg4[%c0_10, %c0_11], %25 {strides = array<i32>} : memref<8x128xf32, #tpu.memory_space<vmem>>, vector<8x128xf32>,
    return
  }
  func.func @transform_0(%arg0: i32, %arg1: i32) -> (i32, i32) {
    %c1_i32 = arith.constant 1 : i32
    %0 = arith.muli %arg0, %c1_i32 : i32
    %1 = arith.addi %0, %arg1 : i32
    %c0_i32 = arith.constant 0 : i32
    %c0_i32_0 = arith.constant 0 : i32
    return %1, %c0_i32 : i32, i32
  }
  func.func @transform_1(%arg0: i32, %arg1: i32) -> (i32, i32) {
    %c1_i32 = arith.constant 1 : i32
    %0 = arith.muli %arg0, %c1_i32 : i32
    %1 = arith.addi %0, %arg1 : i32
    %c0_i32 = arith.constant 0 : i32
    %c0_i32_0 = arith.constant 0 : i32
    return %1, %c0_i32 : i32, i32
  }
  func.func @transform_2(%arg0: i32, %arg1: i32) -> (i32, i32) {
    %c0_i32 = arith.constant 0 : i32
    %c0_i32_0 = arith.constant 0 : i32
    return %arg0, %c0_i32 : i32, i32
  }
}

</mosaic_0001>

<bundles_post_ra>
// kernel: tpu_custom_call.1
= control target key start
LH: loop header
LB: loop body
LE: loop exit
PB: predicated region body
PF: predicated region fallthrough
CT: control target
= control target key end

     0   :  { %7 = vsyncpa [#allocation3], 0  ;;  %s848_s0 = inlined_call_operand.hbm [shape: f32[16,128], index: 0, kind: input, shape index: {}]   ;;  %s849_s1 = inlined_call_operand.hbm [shape: f32[16,128], index: 1, kind: input, shape index: {}]   ;;  %s850_s2 = inlined_call_operand.hbm [shape: f32[16,128], index: 2, kind: output, shape index: {}]  }
   0x1   :  { %9 = vsyncpa [#allocation3 + $0x1], 0 }
   0x2   :  { %10 = vsyncpa [#allocation6], 0 }
   0x3   :  { %12 = vsyncpa [#allocation6 + $0x1], 0 }
   0x4   :  { %13 = vsyncpa [#allocation4], 0 }
   0x5   :  { %15 = vsyncpa [#allocation4 + $0x1], 0  ;;  %s623_s9 = smov 0   ;;  %s625_s10 = smov 0  }
   0x6   :  { %s627_s11 = smov 0   ;;  %s629_s12 = smov 0  }
   0x7   :  { %s631_s13 = smov 0   ;;  %s633_s14 = smov 0  }
   0x8 LB: > { %s367_s15 = sadd.s32 4294967295, %s603_s14   ;;  %s368_s16 = sadd.s32 4294967294, %s603_s14   ;;  %s603_s14 = sphi %s633_s14, %s21_s14   ;;  %s599_s13 = sphi %s631_s13, %s870_s13   ;;  %s595_s12 = sphi %s629_s12, %s869_s12   ;;  %s591_s11 = sphi %s627_s11, %s868_s11   ;;  %s587_s10 = sphi %s625_s10, %s867_s10   ;;  %s583_s9 = sphi %s623_s9, %s866_s9  }
   0x9   : > { %s33_s17 = sadd.s32 1, %s599_s13  ;;  %s42_s18 = sadd.s32 1, %s591_s11 }
   0xa   : > { %p35_p0 = scmp.ge.s32.totalorder %s33_s17, 2  ;;  %p49_p1 = scmp.ne.s32.totalorder %s591_s11, %s587_s10 }
   0xb   : > { %p50_p2 = scmp.eq.s32.totalorder %s603_s14, 0  ;;  %p55_p3 = scmp.ne.s32.totalorder %s587_s10, %s583_s9 }
   0xc   : > { %s872_s17 = smov (%p35_p0, %s33_s17), 0  ;;  %p56_p5 = scmp.eq.s32.totalorder %s367_s15, 0 }
   0xd   : > { %p664_p4 = por %p50_p2, %p49_p1  ;;  %s39_s20 = ssub.s32 %s599_s13, %s872_s17 }
   0xe   : > { %p107_p6 = scmp.eq.s32.totalorder %s367_s15, 1  ;;  %p40_p7 = scmp.eq.s32.totalorder %s39_s20, 0 }
   0xf   : > { %p670_p8 = por %p56_p5, %p55_p3  ;;  %p113_p10 = scmp.eq.s32.totalorder %s368_s16, 1 }
  0x10   : > { %p674_p9 = por %p107_p6, %p49_p1  ;;  %p400_p13 = scmp.lt.s32.totalorder %s603_s14, 2 }
  0x11   : > { %s854_s21 = scalar_select %p670_p8, 1, 0 }
  0x12   : > { %s855_s22 = scalar_select %p674_p9, 1, 0 }
  0x13   : > { %s679_s23 = scalar_select %p40_p7, %s591_s11, %s42_s18  }
  0x14   : > { %p681_p11 = por %p113_p10, %p55_p3  ;;  %s688_s25 = sand.u32 1, %s591_s11  }
  0x15   : > { %s371_s26 = sshll.u32 %s688_s25, 3  ;;  %s372_s27 = sshll.u32 %s599_s13, 7 }
  0x16   : > { %s856_s24 = scalar_select %p681_p11, 1, 0 }
  0x17   : > { %s697_s30 = scalar_lea.hbm %s848_s0, %s372_s27  ;;  %s137_s3 = scalar_lea.vmem [#allocation2], %s371_s26 }
  0x18   : > { %s145_s4 = sshll.u32 %s137_s3, 4  ;;  %p705_p0 = pnand %p400_p13, %p664_p4  ;;  %s701_s4 = int_to_ptr.vmem [resolvable:$true] %s145_s4 }
  0x19   : > { %s134_s6 = scalar_lea.sflag [#allocation3], %s688_s25  ;;  %s457_s7 = scalar_lea.hbm %s697_s30, 128 }
  0x1a   : > { %p458_p3 = scmp.ne.s32.totalorder %s697_s30, %s457_s7  ;;  %p459_p5 = pneg %p705_p0 }
  0x1b   : > { %s462_s16 = scalar_lea.hbm %s848_s0, 256  ;;  %p463_p4 = scmp.lt.u32.totalorder %s697_s30, %s848_s0 }
  0x1c   : > { %p460_p6 = pnand %p459_p5, %p458_p3  ;;  %p464_p10 = scmp.lt.u32.totalorder %s462_s16, %s457_s7 }
  0x1d   : > { %p466_p12 = scmp.lt.u32.totalorder %s457_s7, %s697_s30 }
  0x1e   : > { %p461_p7 = pneg %p460_p6  ;;  %p465_p13 = por %p464_p10, %p463_p4 }
  0x20   : > { %p467_p1 = por %p466_p12, %p465_p13 }
  0x22   : > { %p468_p2 = pnand %p467_p1, %p461_p7 }
  0x24   : > { %471 = shalt.err (!%p468_p2)
}
  0x25   : > { %s472_s20 = scalar_lea.vmem %s701_s4, 128  ;;  %s605_s28 = smov [#allocation2]  }
  0x26   : > { %p473_p3 = scmp.ne.s32.totalorder %s701_s4, %s472_s20  ;;  %s477_s29 = sshll.u32 %s605_s28, 4  ;;  %s478_s29 = int_to_ptr.vmem [resolvable:$false] %s477_s29 }
  0x27   : > { %s479_s3 = scalar_lea.vmem %s478_s29, 256  ;;  %p480_p9 = scmp.lt.s32.totalorder %s701_s4, %s478_s29 }
  0x28   : > { %p475_p6 = pnand %p473_p3, %p459_p5  ;;  %p481_p4 = scmp.lt.s32.totalorder %s479_s3, %s472_s20 }
  0x2a   : > { %p476_p11 = pneg %p475_p6  ;;  %p482_p10 = por %p481_p4, %p480_p9 }
  0x2c   : > { %p483_p12 = pnand %p482_p10, %p476_p11 }
  0x2e   : > { %486 = shalt.err (!%p483_p12)
}
  0x2f   : > { %392 = dma.hbm_to_vmem [thread:$0]  (!%p705_p0), %s697_s30, 128, %s701_s4, %s134_s6  }
  0x30   : > { %p858_p1 = scmp.lt.s32.totalorder %s603_s14, 3  ;;  %p859_p2 = scmp.ge.s32.totalorder %s603_s14, 1 }
  0x31   : > { %s750_s16 = scalar_lea.hbm %s849_s1, %s372_s27  ;;  %s156_s18 = scalar_lea.vmem [#allocation5], %s371_s26 }
  0x32   : > { %p741_p7 = pnand %p859_p2, %p858_p1  ;;  %s164_s19 = sshll.u32 %s156_s18, 4  ;;  %s165_s19 = int_to_ptr.vmem [resolvable:$true] %s164_s19 }
  0x33   : > { %s153_s30 = scalar_lea.sflag [#allocation6], %s688_s25  ;;  %s487_s4 = scalar_lea.hbm %s750_s16, 128 }
  0x34   : > { %s860_s7 = scalar_select %p741_p7, 1, 0 }
  0x35   : > { %p488_p9 = scmp.ne.s32.totalorder %s750_s16, %s487_s4  ;;  %s492_s27 = scalar_lea.hbm %s849_s1, 256 }
  0x36   : > { %p493_p3 = scmp.lt.u32.totalorder %s750_s16, %s849_s1  ;;  %p494_p6 = scmp.lt.u32.totalorder %s492_s27, %s487_s4 }
  0x37   : > { %p490_p11 = pnand %p488_p9, %p459_p5  ;;  %p496_p10 = scmp.lt.u32.totalorder %s487_s4, %s750_s16 }
  0x38   : > { %p495_p4 = por %p494_p6, %p493_p3 }
  0x39   : > { %p491_p13 = pneg %p490_p11 }
  0x3a   : > { %p497_p12 = por %p496_p10, %p495_p4 }
  0x3c   : > { %p498_p1 = pnand %p497_p12, %p491_p13 }
  0x3e   : > { %501 = shalt.err (!%p498_p1)
}
  0x3f   : > { %s502_s25 = scalar_lea.vmem %s165_s19, 128  ;;  %s606_s26 = smov [#allocation5]  }
  0x40   : > { %p503_p2 = scmp.ne.s32.totalorder %s165_s19, %s502_s25  ;;  %s507_s3 = sshll.u32 %s606_s26, 4  ;;  %s508_s3 = int_to_ptr.vmem [resolvable:$false] %s507_s3 }
  0x41   : > { %s509_s8 = scalar_lea.vmem %s508_s3, 256  ;;  %p510_p8 = scmp.lt.s32.totalorder %s165_s19, %s508_s3 }
  0x42   : > { %p505_p9 = pnand %p503_p2, %p459_p5  ;;  %p511_p7 = scmp.lt.s32.totalorder %s509_s8, %s502_s25 }
  0x44   : > { %p506_p11 = pneg %p505_p9  ;;  %p512_p3 = por %p511_p7, %p510_p8 }
  0x46   : > { %p513_p6 = pnand %p512_p3, %p506_p11 }
  0x48   : > { %516 = shalt.err (!%p513_p6)
}
  0x49   : > { %395 = dma.hbm_to_vmem [thread:$0]  (!%p705_p0), %s750_s16, 128, %s165_s19, %s153_s30  }
  0x4a   : > { %p861_p13 = scmp.ne.s32.totalorder %s860_s7, 0 }
  0x4b   : > { %s777_s15 = sand.u32 (!%p861_p13), 1, %s587_s10   ;;  %p862_p8 = scmp.ne.s32.totalorder (!%p861_p13), %s854_s21, 0 }
  0x4c   : > { %173 = sbr.rel (%p861_p13) target bundleno = 157 (0x9d), region = 28  ;;  %s780_s18 = sshll.u32 (!%p861_p13), %s777_s15, 3 }
  0x4d   : > { %s176_s4 = scalar_lea.sflag (!%p861_p13), [#allocation3], %s777_s15  ;;  %s179_s6 = scalar_lea.vmem (!%p861_p13), [#allocation2], %s780_s18 }
  0x53   : > { %570 = dma.done.wait (%p862_p8), %s176_s4, 128  }
  0x54   : > { %572 = vsyncadd (%p862_p8), %s176_s4, 4294967168  ;;  %s185_s5 = scalar_lea.sflag [#allocation6], %s777_s15  ;;  %s188_s7 = scalar_lea.vmem [#allocation5], %s780_s18 }
  0x55   : > { %574 = dma.done.wait (%p862_p8), %s185_s5, 128  }
  0x56   : > { %576 = vsyncadd (%p862_p8), %s185_s5, 4294967168  ;;  %v221_v0 = vld [vmem:[%s179_s6] sm:$0xff]  ;;  %v222_v7 = vld [vmem:[%s188_s7] sm:$0xff]  ;;  %s380_s21 = sshll.u32 %s595_s12, 7  ;;  %s213_s16 = scalar_lea.vmem [#allocation7], %s780_s18 }
  0x57   : > { %v226_v1 = vand.u32 2147483647, %v221_v0  ;;  %v223_v9 = vmax.f32 %v221_v0, 0.0  ;;  %v224_v10 = vmul.f32 %v222_v7, %v221_v0  ;;  %s264_s19 = sshll.u32 %s213_s16, 4  ;;  %s799_s27 = scalar_lea.hbm %s850_s2, %s380_s21  ;;  %s801_s19 = int_to_ptr.vmem [resolvable:$true] %s264_s19 }
  0x58   : > { %s251_s28 = scalar_lea.sflag [#allocation4], %s777_s15  ;;  %s517_s29 = scalar_lea.vmem %s801_s19, 128 }
  0x59   : > { %v227_v2 = vsub.f32 0.0, %v226_v1  ;;  %v225_v14 = vsub.f32 %v223_v9, %v224_v10  ;;  %p518_p0 = scmp.ne.s32.totalorder %s801_s19, %s517_s29  ;;  %p863_p5 = scmp.ne.s32.totalorder %s855_s22, 0 }
  0x5a   : > { %s607_s12 = smov [#allocation7]  }
  0x5b   : > { %v228_v3 = vmul.f32 1.442695, %v227_v2  ;;  %p519_p7 = pnand %p518_p0, %p863_p5  ;;  %s521_s25 = sshll.u32 %s607_s12, 4  ;;  %s522_s25 = int_to_ptr.vmem [resolvable:$false] %s521_s25 }
  0x5c   : > { %s523_s26 = scalar_lea.vmem %s522_s25, 256  ;;  %p524_p10 = scmp.lt.s32.totalorder %s801_s19, %s522_s25 }
  0x5d   : > { %451 = vpow2.f32 %v228_v3  ;;  %p520_p4 = pneg %p519_p7  ;;  %p525_p12 = scmp.lt.s32.totalorder %s523_s26, %s517_s29 }
  0x5f   : > { %p526_p1 = por %p525_p12, %p524_p10 }
  0x61   : > { %p527_p2 = pnand %p526_p1, %p520_p4 }
  0x67   : > { %v452_v4 = vpop.eup %451 }
  0x68   : > { %v230_v5 = vadd.f32 1.0, %v452_v4  ;;  %v233_v6 = vmul.f32 -0.5, %v452_v4  ;;  %v236_v11 = vand.u32 2147483647, %v452_v4 }
  0x6a   : > { %453 = vlog2.f32 %v230_v5  ;;  %v234_v8 = vadd.f32 1.0, %v233_v6  ;;  %vm237_vm0 = vcmp.lt.f32.partialorder %v236_v11, 0.0004427343 }
  0x6c   : > { %v235_v12 = vmul.f32 %v452_v4, %v234_v8 }
  0x74   : > { %v454_v13 = vpop.eup %453 }
  0x75   : > { %v232_v15 = vmul.f32 0.6931472, %v454_v13 }
  0x77   : > { %v238_v16 = vsel %vm237_vm0, %v235_v12, %v232_v15 }
  0x78   : > { %v239_v17 = vadd.f32 %v238_v16, %v225_v14 }
  0x7a   : > { %v240_v18 = vsub.f32 0.0, %v239_v17 }
  0x7c   : > { %v241_v19 = vmul.f32 1.442695, %v240_v18 }
  0x7e   : > { %455 = vpow2.f32 %v241_v19 }
  0x88   : > { %v456_v20 = vpop.eup %455 }
  0x89   : > { %v243_v21 = vsub.f32 1.0, %v456_v20 }
  0x8b   : > { %v244_v22 = vmul.f32 %v243_v21, %v243_v21 }
  0x8d   : > { %v245_v23 = vmul.f32 %v244_v22, %v239_v17 }
  0x8f   : > { %249 = vst [vmem:[%s213_s16] sm:$0xff] %v245_v23 }
  0x90   : > { %530 = shalt.err (!%p527_p2)
}
  0x91   : > { %s531_s3 = scalar_lea.hbm %s799_s27, 128  ;;  %s535_s18 = scalar_lea.hbm %s850_s2, 256 }
  0x92   : > { %p532_p9 = scmp.ne.s32.totalorder %s799_s27, %s531_s3  ;;  %p536_p6 = scmp.lt.u32.totalorder %s799_s27, %s850_s2 }
  0x93   : > { %p537_p13 = scmp.lt.u32.totalorder %s535_s18, %s531_s3  ;;  %p539_p0 = scmp.lt.u32.totalorder %s531_s3, %s799_s27 }
  0x94   : > { %p533_p11 = pnand %p532_p9, %p863_p5 }
  0x95   : > { %p538_p8 = por %p537_p13, %p536_p6 }
  0x96   : > { %p534_p3 = pneg %p533_p11 }
  0x97   : > { %p540_p7 = por %p539_p0, %p538_p8 }
  0x99   : > { %p541_p4 = pnand %p540_p7, %p534_p3 }
  0x9b   : > { %544 = shalt.err (!%p541_p4)
}
  0x9c   : > { %387 = dma.vmem_to_hbm [thread:$0]  (%p863_p5), %s801_s19, 128, %s799_s27, %s251_s28  }
  0x9d PF: > { %s276_s5 = sand.u32 1, %s583_s9   ;;  %p864_p10 = scmp.ne.s32.totalorder %s856_s24, 0 }
  0x9e   : > { %p865_p12 = scmp.ge.s32.totalorder %s603_s14, 2  ;;  %s277_s7 = scalar_lea.sflag [#allocation4], %s276_s5 }
  0xa0   : > { %p397_p1 = pnand %p865_p12, %p864_p10 }
  0xa2   : > { %578 = dma.done.wait (!%p397_p1), %s277_s7, 128  }
  0xa3   : > { %580 = vsyncadd (!%p397_p1), %s277_s7, 4294967168  ;;  %s21_s14 = sadd.s32 1, %s603_s14   ;;  %s866_s9 = smov %s587_s10 }
  0xa4   : > { %p18_p2 = scmp.ge.s32.totalorder %s21_s14, 4   ;;  %s867_s10 = smov %s591_s11 }
  0xa5   : > { %s868_s11 = smov %s679_s23  ;;  %s869_s12 = smov %s599_s13 }
  0xa6   : > { %s870_s13 = smov %s872_s17  ;;  %20 = sbr.rel (!%p18_p2) target bundleno = 8 (0x8), region = 90 }
  0xad   :  { %282 = vsyncpa [#allocation3], 1 }
  0xae   :  { %284 = vsyncpa [#allocation3 + $0x1], 1 }
  0xaf   :  { %285 = vsyncpa [#allocation6], 1 }
  0xb0   :  { %287 = vsyncpa [#allocation6 + $0x1], 1 }
  0xb1   :  { %288 = vsyncpa [#allocation4], 1 }
  0xb2   :  { %290 = vsyncpa [#allocation4 + $0x1], 1 }

</bundles_post_ra>
